<compile_context>
chip_gen: v6e
topology: v6e:2x2x1
jax: 0.10.0
libtpu: 0.0.40
codegen_flags: <defaults>
</compile_context>

<pallas_src>
import numpy as np
import jax
import jax.numpy as jnp
from jax.experimental import pallas as pl
from jax.experimental.pallas import tpu as pltpu

_OUT_W = 128  # lane-dense packed output width per step: [h (H) | q (A) | zero pad]


def _make_kernel(H, A):
    def kernel(x_ref, m_ref, h0_ref,
               w_in_ref, b_in_ref, w_gru_ref, b_gru_ref,
               w_ent_ref, b_ent_ref, w_qw_ref, s_sum_ref, b_q_ref,
               out_ref, h_carry):
        t = pl.program_id(0)

        # Load the initial hidden state into the carried VMEM scratch once.
        @pl.when(t == 0)
        def _():
            h_carry[...] = h0_ref[...]

        x_in = x_ref[0]            # (B, D)    current timestep inputs
        m_flat = m_ref[0]          # (B, 4F)   current timestep macro features
        h_prev = h_carry[...]      # (B, H)

        # ---- fc1 | fc2 fused into one (D, H+4) matmul ----
        pre = jnp.dot(x_in, w_in_ref[...],
                      preferred_element_type=jnp.float32) + b_in_ref[...]
        x = jnp.maximum(pre[:, :H], 0.0)       # relu(fc1(inputs))
        logits = pre[:, H:]                    # fc2(inputs), width 4

        # ---- exact softmax over the 4 logits ----
        mx = jnp.max(logits, axis=-1, keepdims=True)
        ex = jnp.exp(logits - mx)
        qw = ex / jnp.sum(ex, axis=-1, keepdims=True)      # (B, 4)

        # ---- GRUCell: ih and hh dots fused into one block-diagonal matmul:
        #      cat([x, h_prev]) (B, 2H) @ blockdiag(W_ih.T, W_hh.T) (2H, 6H) ----
        xh = jnp.concatenate([x, h_prev], axis=-1)
        gates = jnp.dot(xh, w_gru_ref[...],
                        preferred_element_type=jnp.float32) + b_gru_ref[...]
        gi = gates[:, :3 * H]                  # x  @ W_ih.T + b_ih
        gh = gates[:, 3 * H:]                  # h  @ W_hh.T + b_hh
        # sigmoid(v) == 0.5 * tanh(v/2) + 0.5  (EUP tanh, no VPU divide)
        r = 0.5 * jnp.tanh(0.5 * (gi[:, :H] + gh[:, :H])) + 0.5
        z = 0.5 * jnp.tanh(0.5 * (gi[:, H:2 * H] + gh[:, H:2 * H])) + 0.5
        n = jnp.tanh(gi[:, 2 * H:] + r * gh[:, 2 * H:])
        h_new = (1.0 - z) * n + z * h_prev     # (B, H)

        # ---- entity Linears pre-composed with fc_q's emb columns (no activation
        #      between them in the reference module):
        #      cat([macro_flat, h]) (B, 4F+H) @ W_ent (4F+H, 4A) ----
        xm = jnp.concatenate([m_flat, h_new], axis=-1)
        comp = jnp.dot(xm, w_ent_ref[...],
                       preferred_element_type=jnp.float32) + b_ent_ref[...]   # (B, 4A)

        # ---- softmax-weight replication (R) and fc_q's qw columns fused into one
        #      (4, 4A+A) slab; weighted 4-way segment sum via constant S matmul ----
        qrep = jnp.dot(qw, w_qw_ref[...], preferred_element_type=jnp.float32)
        qw_rep = qrep[:, :4 * A]               # qw_k replicated over each A-block
        q_qw = qrep[:, 4 * A:]                 # qw @ Wq_qw.T
        q = (jnp.dot(qw_rep * comp, s_sum_ref[...],
                     preferred_element_type=jnp.float32) + q_qw + b_q_ref[...])

        # ---- carry hidden state; single unmasked 128-lane packed store ----
        h_carry[...] = h_new
        pad = jnp.zeros((h_new.shape[0], _OUT_W - H - A), jnp.float32)
        out_ref[0] = jnp.concatenate([h_new, q, pad], axis=-1)

    return kernel


def rnn_agent_forward_seq(inputs_seq, hidden_state, macro_seq, packed_weights,
                          *, rnn_hidden_dim, n_actions):
    """Runs T chained RNNAgent.forward steps in one pallas_call.

    inputs_seq  : (T, B, input_shape)
    hidden_state: reshapable to (B, H)
    macro_seq   : (T, B, 4, F) zero-padded macro features
    Returns q_seq (T, B, A) and h_seq (T, B, H); h_seq[-1] is the final state.
    """
    T, B, D = inputs_seq.shape
    H, A = rnn_hidden_dim, n_actions
    F = macro_seq.shape[-1]
    assert H + A <= _OUT_W
    h0 = hidden_state.reshape(B, H).astype(jnp.float32)
    macro_flat = macro_seq.reshape(T, B, 4 * F).astype(jnp.float32)

    step_map = lambda t: (t, 0, 0)     # streamed per-timestep blocks
    const_map = lambda t: (0, 0)       # resident (weights, h0) blocks

    in_specs = [
        pl.BlockSpec((1, B, D), step_map),          # inputs[t]
        pl.BlockSpec((1, B, 4 * F), step_map),      # macro[t]
        pl.BlockSpec((B, H), const_map),            # h0 (read only at t == 0)
    ] + [pl.BlockSpec(w.shape, const_map) for w in packed_weights]

    out = pl.pallas_call(
        _make_kernel(H, A),
        out_shape=jax.ShapeDtypeStruct((T, B, _OUT_W), jnp.float32),
        grid_spec=pltpu.PrefetchScalarGridSpec(
            num_scalar_prefetch=0,
            grid=(T,),                               # timestep loop inside the kernel
            in_specs=in_specs,
            out_specs=pl.BlockSpec((1, B, _OUT_W), step_map),
            scratch_shapes=[pltpu.VMEM((B, H), jnp.float32)],   # carried hidden state
        ),
        compiler_params=pltpu.CompilerParams(
            dimension_semantics=("arbitrary",)),     # sequential recurrence
    )(inputs_seq.astype(jnp.float32), macro_flat, h0, *packed_weights)

    h_seq = out[:, :, :H]
    q_seq = out[:, :, H:H + A]
    return q_seq, h_seq


def rnn_agent_forward(inputs, hidden_state, macro_inputs, packed_weights,
                      *, rnn_hidden_dim, n_actions):
    """Single-step forward matching RNNAgent.forward(select_action=False)."""
    q_seq, h_seq = rnn_agent_forward_seq(
        inputs[None], hidden_state, macro_inputs[None], packed_weights,
        rnn_hidden_dim=rnn_hidden_dim, n_actions=n_actions)
    return q_seq[0], h_seq[0]


def init_params(key, D, H, A, feat_sizes):
    """Deterministic synthetic torch-layout params: weight (out, in), bias (out,)."""
    specs = [
        ("fc1", H, D),
        ("fc2", 4, D),
        ("gru_ih", 3 * H, H),
        ("gru_hh", 3 * H, H),
        ("move", H, feat_sizes[0] + H),
        ("enemy", H, feat_sizes[1] + H),
        ("ally", H, feat_sizes[2] + H),
        ("own", H, feat_sizes[3] + H),
        ("fcq", A, H + 4),
    ]
    ks = jax.random.split(key, 2 * len(specs))
    p = {}
    for i, (name, out_d, in_d) in enumerate(specs):
        p[f"{name}_w"] = 0.1 * jax.random.normal(ks[2 * i], (out_d, in_d), jnp.float32)
        p[f"{name}_b"] = 0.05 * jax.random.normal(ks[2 * i + 1], (out_d,), jnp.float32)
    return p


def pack_params(p, H, A, F, feat_sizes):
    """Pack torch-layout params into the 9 pre-transposed slabs the kernel uses.

    Done in numpy f32 on host (exact), including the entity/fc_q weight pre-composition.
    """
    p = {k: np.asarray(v, dtype=np.float32) for k, v in p.items()}

    # 1) fc1 | fc2 fused
    w_in = np.concatenate([p["fc1_w"].T, p["fc2_w"].T], axis=1)            # (D, H+4)
    b_in = np.concatenate([p["fc1_b"], p["fc2_b"]])[None, :]               # (1, H+4)

    # 2) GRU block-diagonal: cat([x, h]) @ W -> [gi | gh]
    w_gru = np.zeros((2 * H, 6 * H), np.float32)
    w_gru[:H, :3 * H] = p["gru_ih_w"].T
    w_gru[H:, 3 * H:] = p["gru_hh_w"].T
    b_gru = np.concatenate([p["gru_ih_b"], p["gru_hh_b"]])[None, :]        # (1, 6H)

    # 3) entity Linears pre-composed with fc_q's emb columns.
    #    Rows beyond each entity's true feature count stay zero, so padded macro
    #    features are ignored exactly like the PyTorch slicing macro[:, k, :feat_k].
    wq_emb = p["fcq_w"][:, :H]                                             # (A, H)
    wq_qw = p["fcq_w"][:, H:]                                              # (A, 4)
    w_ent = np.zeros((4 * F + H, 4 * A), np.float32)
    b_ent = np.zeros((1, 4 * A), np.float32)
    for k, name in enumerate(["move", "enemy", "ally", "own"]):
        w = p[f"{name}_w"]                                                 # (H, feat_k+H)
        fk = feat_sizes[k]
        wc = wq_emb @ w                                                    # (A, feat_k+H)
        w_ent[k * F:k * F + fk, k * A:(k + 1) * A] = wc[:, :fk].T
        w_ent[4 * F:, k * A:(k + 1) * A] = wc[:, fk:].T
        b_ent[0, k * A:(k + 1) * A] = wq_emb @ p[f"{name}_b"]

    # 4) qw slab: [R | Wq_qw.T] : replication matrix + fc_q's qw columns
    R = np.zeros((4, 4 * A), np.float32)
    for k in range(4):
        R[k, k * A:(k + 1) * A] = 1.0
    w_qw = np.concatenate([R, wq_qw.T], axis=1)                            # (4, 5A)

    # 5) block-sum slab S: sums the 4 A-wide blocks
    s_sum = np.zeros((4 * A, A), np.float32)
    for k in range(4):
        s_sum[k * A:(k + 1) * A, :] = np.eye(A, dtype=np.float32)

    b_q = p["fcq_b"][None, :]                                              # (1, A)

    return [jnp.asarray(a) for a in
            (w_in, b_in, w_gru, b_gru, w_ent, b_ent, w_qw, s_sum, b_q)]


def _reference_step(p, inputs, h_in, macro, feat_sizes, H):
    """Pure-JAX transcript of the PyTorch RNNAgent.forward (select_action=False)."""
    hp = jax.lax.Precision.HIGHEST
    lin = lambda w, b, v: jnp.dot(v, w.T, precision=hp) + b
    x = jax.nn.relu(lin(p["fc1_w"], p["fc1_b"], inputs))
    gi = lin(p["gru_ih_w"], p["gru_ih_b"], x)
    gh = lin(p["gru_hh_w"], p["gru_hh_b"], h_in)
    r = jax.nn.sigmoid(gi[:, :H] + gh[:, :H])
    z = jax.nn.sigmoid(gi[:, H:2 * H] + gh[:, H:2 * H])
    n = jnp.tanh(gi[:, 2 * H:] + r * gh[:, 2 * H:])
    h = (1.0 - z) * n + z * h_in
    qw = jax.nn.softmax(lin(p["fc2_w"], p["fc2_b"], inputs), axis=-1)
    qs = []
    for k, name in enumerate(["move", "enemy", "ally", "own"]):
        fk = feat_sizes[k]
        emb = lin(p[f"{name}_w"], p[f"{name}_b"],
                  jnp.concatenate([macro[:, k, :fk], h], axis=-1))
        qs.append(lin(p["fcq_w"], p["fcq_b"],
                      jnp.concatenate([emb, qw], axis=-1)))
    q = jnp.sum(qw[:, :, None] * jnp.stack(qs, axis=1), axis=1)
    return q, h


if __name__ == "__main__":
    T = 8                       # chained forward steps in one kernel launch
    B = 16                      # batch (agents)
    D = 32                      # input_shape
    H = 64                      # rnn_hidden_dim
    A = 16                      # n_actions
    feat_sizes = (4, 10, 12, 8)  # move / enemy / ally / own feature sizes
    F = 16                      # padded per-entity macro width (>= max feat size)
    assert F >= max(feat_sizes)

    key = jax.random.PRNGKey(0)
    k_in, k_h, k_m, k_p = jax.random.split(key, 4)
    inputs_seq = jax.random.normal(k_in, (T, B, D), jnp.float32)
    hidden = jax.random.normal(k_h, (B, H), jnp.float32)
    macro_seq = jax.random.normal(k_m, (T, B, 4, F), jnp.float32)

    params = init_params(k_p, D, H, A, feat_sizes)
    packed = pack_params(params, H, A, F, feat_sizes)

    # Sequence kernel (T steps, weights resident, h carried in VMEM scratch).
    q_seq, h_seq = rnn_agent_forward_seq(inputs_seq, hidden, macro_seq, packed,
                                         rnn_hidden_dim=H, n_actions=A)
    q_seq, h_seq = jax.block_until_ready((q_seq, h_seq))
    assert q_seq.shape == (T, B, A) and h_seq.shape == (T, B, H)

    # Single-step API (matches the PyTorch forward signature).
    q0, h0_out = rnn_agent_forward(inputs_seq[0], hidden, macro_seq[0], packed,
                                   rnn_hidden_dim=H, n_actions=A)
    q0, h0_out = jax.block_until_ready((q0, h0_out))
    assert q0.shape == (B, A) and h0_out.shape == (B, H)

    # Pure-JAX reference of the PyTorch module, chained over T steps.
    h_ref = hidden
    q_ref_steps = []
    for t in range(T):
        qt, h_ref = _reference_step(params, inputs_seq[t], h_ref, macro_seq[t],
                                    feat_sizes, H)
        q_ref_steps.append(qt)
    q_ref = jnp.stack(q_ref_steps)

    np.testing.assert_allclose(np.asarray(q_seq), np.asarray(q_ref),
                               rtol=2e-2, atol=2e-2)
    np.testing.assert_allclose(np.asarray(h_seq[-1]), np.asarray(h_ref),
                               rtol=2e-2, atol=2e-2)
    np.testing.assert_allclose(np.asarray(q0), np.asarray(q_ref[0]),
                               rtol=2e-2, atol=2e-2)

    print("KERNEL_OK")
</pallas_src>

<mosaic_0001>
module attributes {stable_mosaic.version = 11 : i64} {
  func.func @kernel(%arg0: i32, %arg1: memref<1x16x32xf32, #tpu.memory_space<vmem>>, %arg2: memref<1x16x64xf32, #tpu.memory_space<vmem>>, %arg3: memref<16x64xf32, #tpu.memory_space<vmem>>, %arg4: memref<32x68xf32, #tpu.memory_space<vmem>>, %arg5: memref<1x68xf32, #tpu.memory_space<vmem>>, %arg6: memref<128x384xf32, #tpu.memory_space<vmem>>, %arg7: memref<1x384xf32, #tpu.memory_space<vmem>>, %arg8: memref<128x64xf32, #tpu.memory_space<vmem>>, %arg9: memref<1x64xf32, #tpu.memory_space<vmem>>, %arg10: memref<4x80xf32, #tpu.memory_space<vmem>>, %arg11: memref<64x16xf32, #tpu.memory_space<vmem>>, %arg12: memref<1x16xf32, #tpu.memory_space<vmem>>, %arg13: memref<1x16x128xf32, #tpu.memory_space<vmem>>, %arg14: memref<16x64xf32, #tpu.memory_space<vmem>>) attributes {dimension_semantics = [#tpu.dimension_semantics<arbitrary>], iteration_bounds = array<i64: 8>, scalar_prefetch = 0 : i64, scratch_operands = 1 : i64, tpu.core_type = #tpu.core_type<tc>, window_params = [{transform_indices = @transform_0, window_bounds = array<i64: 1, 16, 32>}, {transform_indices = @transform_1, window_bounds = array<i64: 1, 16, 64>}, {pipeline_mode = #tpu.pipeline_mode<synchronous>, transform_indices = @transform_2, window_bounds = array<i64: 16, 64>}, {pipeline_mode = #tpu.pipeline_mode<synchronous>, transform_indices = @transform_3, window_bounds = array<i64: 32, 68>}, {pipeline_mode = #tpu.pipeline_mode<synchronous>, transform_indices = @transform_4, window_bounds = array<i64: 1, 68>}, {pipeline_mode = #tpu.pipeline_mode<synchronous>, transform_indices = @transform_5, window_bounds = array<i64: 128, 384>}, {pipeline_mode = #tpu.pipeline_mode<synchronous>, transform_indices = @transform_6, window_bounds = array<i64: 1, 384>}, {pipeline_mode = #tpu.pipeline_mode<synchronous>, transform_indices = @transform_7, window_bounds = array<i64: 128, 64>}, {pipeline_mode = #tpu.pipeline_mode<synchronous>, transform_indices = @transform_8, window_bounds = array<i64: 1, 64>}, {pipeline_mode = #tpu.pipeline_mode<synchronous>, transform_indices = @transform_9, window_bounds = array<i64: 4, 80>}, {pipeline_mode = #tpu.pipeline_mode<synchronous>, transform_indices = @transform_10, window_bounds = array<i64: 64, 16>}, {pipeline_mode = #tpu.pipeline_mode<synchronous>, transform_indices = @transform_11, window_bounds = array<i64: 1, 16>}, {transform_indices = @transform_12, window_bounds = array<i64: 1, 16, 128>}]} {
    %c0_i32 = arith.constant 0 : i32
    %0 = arith.cmpi eq, %arg0, %c0_i32 : i32
    %1 = arith.extui %0 : i1 to i32
    %c0_i32_0 = arith.constant 0 : i32
    %2 = arith.cmpi ne, %1, %c0_i32_0 : i32
    scf.if %2 {
      %c0_46 = arith.constant 0 : index
      %c0_47 = arith.constant 0 : index
      %87 = vector.load %arg3[%c0_46, %c0_47] : memref<16x64xf32, #tpu.memory_space<vmem>>, vector<16x64xf32>
      %c0_48 = arith.constant 0 : index
      %c0_49 = arith.constant 0 : index
      %88 = vector.load %arg14[%c0_48, %c0_49] : memref<16x64xf32, #tpu.memory_space<vmem>>, vector<16x64xf32>
      tpu.vector_store %arg14[%c0_48, %c0_49], %87 {strides = array<i32>} : memref<16x64xf32, #tpu.memory_space<vmem>>, vector<16x64xf32>,
    } else {
    }
    %c0 = arith.constant 0 : index
    %c0_1 = arith.constant 0 : index
    %c0_2 = arith.constant 0 : index
    %3 = vector.load %arg1[%c0, %c0_1, %c0_2] : memref<1x16x32xf32, #tpu.memory_space<vmem>>, vector<1x16x32xf32>
    %4 = vector.shape_cast %3 : vector<1x16x32xf32> to vector<16x32xf32>
    %c0_3 = arith.constant 0 : index
    %c0_4 = arith.constant 0 : index
    %c0_5 = arith.constant 0 : index
    %5 = vector.load %arg2[%c0_3, %c0_4, %c0_5] : memref<1x16x64xf32, #tpu.memory_space<vmem>>, vector<1x16x64xf32>
    %6 = vector.shape_cast %5 : vector<1x16x64xf32> to vector<16x64xf32>
    %c0_6 = arith.constant 0 : index
    %c0_7 = arith.constant 0 : index
    %7 = vector.load %arg14[%c0_6, %c0_7] : memref<16x64xf32, #tpu.memory_space<vmem>>, vector<16x64xf32>
    %c0_8 = arith.constant 0 : index
    %c0_9 = arith.constant 0 : index
    %8 = vector.load %arg4[%c0_8, %c0_9] : memref<32x68xf32, #tpu.memory_space<vmem>>, vector<32x68xf32>
    %cst = arith.constant dense<0.000000e+00> : vector<16x68xf32>
    %9 = tpu.matmul %4, %8, %cst {dimension_numbers = #tpu.dot_dimension_numbers<[1], [0], [0], [1], [0, 0, 1, 1], [], []>} : vector<16x32xf32>, vector<32x68xf32>, vector<16x68xf32> -> vector<16x68xf32>
    %c0_10 = arith.constant 0 : index
    %c0_11 = arith.constant 0 : index
    %10 = vector.load %arg5[%c0_10, %c0_11] : memref<1x68xf32, #tpu.memory_space<vmem>>, vector<1x68xf32>
    %11 = vector.broadcast %10 : vector<1x68xf32> to vector<16x68xf32>
    %12 = arith.addf %9, %11 : vector<16x68xf32>
    %13 = vector.extract_strided_slice %12 {offsets = [0, 0], sizes = [16, 64], strides = [1, 1]} : vector<16x68xf32> to vector<16x64xf32>
    %cst_12 = arith.constant 0.000000e+00 : f32
    %14 = vector.broadcast %cst_12 : f32 to vector<16x64xf32>
    %15 = arith.maximumf %13, %14 : vector<16x64xf32>
    %16 = vector.extract_strided_slice %12 {offsets = [0, 64], sizes = [16, 4], strides = [1, 1]} : vector<16x68xf32> to vector<16x4xf32>
    %cst_13 = arith.constant dense<0xFF800000> : vector<16xf32>
    %17 = vector.multi_reduction <maximumf>, %16, %cst_13 [1] : vector<16x4xf32> to vector<16xf32>
    %18 = vector.shape_cast %17 : vector<16xf32> to vector<16x1xf32>
    %19 = vector.broadcast %18 : vector<16x1xf32> to vector<16x4xf32>
    %20 = arith.subf %16, %19 : vector<16x4xf32>
    %21 = math.exp %20 : vector<16x4xf32>
    %cst_14 = arith.constant dense<0.000000e+00> : vector<16xf32>
    %22 = vector.multi_reduction <add>, %21, %cst_14 [1] : vector<16x4xf32> to vector<16xf32>
    %23 = vector.shape_cast %22 : vector<16xf32> to vector<16x1xf32>
    %24 = vector.broadcast %23 : vector<16x1xf32> to vector<16x4xf32>
    %25 = arith.divf %21, %24 : vector<16x4xf32>
    %26 = tpu.concatenate %15, %7 in 1 : vector<16x64xf32>, vector<16x64xf32> -> vector<16x128xf32>
    %c0_15 = arith.constant 0 : index
    %c0_16 = arith.constant 0 : index
    %27 = vector.load %arg6[%c0_15, %c0_16] : memref<128x384xf32, #tpu.memory_space<vmem>>, vector<128x384xf32>
    %cst_17 = arith.constant dense<0.000000e+00> : vector<16x384xf32>
    %28 = tpu.matmul %26, %27, %cst_17 {dimension_numbers = #tpu.dot_dimension_numbers<[1], [0], [0], [1], [0, 0, 1, 1], [], []>} : vector<16x128xf32>, vector<128x384xf32>, vector<16x384xf32> -> vector<16x384xf32>
    %c0_18 = arith.constant 0 : index
    %c0_19 = arith.constant 0 : index
    %29 = vector.load %arg7[%c0_18, %c0_19] : memref<1x384xf32, #tpu.memory_space<vmem>>, vector<1x384xf32>
    %30 = vector.broadcast %29 : vector<1x384xf32> to vector<16x384xf32>
    %31 = arith.addf %28, %30 : vector<16x384xf32>
    %32 = vector.extract_strided_slice %31 {offsets = [0, 0], sizes = [16, 192], strides = [1, 1]} : vector<16x384xf32> to vector<16x192xf32>
    %33 = vector.extract_strided_slice %31 {offsets = [0, 192], sizes = [16, 192], strides = [1, 1]} : vector<16x384xf32> to vector<16x192xf32>
    %34 = vector.extract_strided_slice %32 {offsets = [0, 0], sizes = [16, 64], strides = [1, 1]} : vector<16x192xf32> to vector<16x64xf32>
    %35 = vector.extract_strided_slice %33 {offsets = [0, 0], sizes = [16, 64], strides = [1, 1]} : vector<16x192xf32> to vector<16x64xf32>
    %36 = arith.addf %34, %35 : vector<16x64xf32>
    %cst_20 = arith.constant 5.000000e-01 : f32
    %37 = vector.broadcast %cst_20 : f32 to vector<16x64xf32>
    %38 = arith.mulf %37, %36 : vector<16x64xf32>
    %39 = math.tanh %38 : vector<16x64xf32>
    %cst_21 = arith.constant 5.000000e-01 : f32
    %40 = vector.broadcast %cst_21 : f32 to vector<16x64xf32>
    %41 = arith.mulf %40, %39 : vector<16x64xf32>
    %cst_22 = arith.constant 5.000000e-01 : f32
    %42 = vector.broadcast %cst_22 : f32 to vector<16x64xf32>
    %43 = arith.addf %41, %42 : vector<16x64xf32>
    %44 = vector.extract_strided_slice %32 {offsets = [0, 64], sizes = [16, 64], strides = [1, 1]} : vector<16x192xf32> to vector<16x64xf32>
    %45 = vector.extract_strided_slice %33 {offsets = [0, 64], sizes = [16, 64], strides = [1, 1]} : vector<16x192xf32> to vector<16x64xf32>
    %46 = arith.addf %44, %45 : vector<16x64xf32>
    %cst_23 = arith.constant 5.000000e-01 : f32
    %47 = vector.broadcast %cst_23 : f32 to vector<16x64xf32>
    %48 = arith.mulf %47, %46 : vector<16x64xf32>
    %49 = math.tanh %48 : vector<16x64xf32>
    %cst_24 = arith.constant 5.000000e-01 : f32
    %50 = vector.broadcast %cst_24 : f32 to vector<16x64xf32>
    %51 = arith.mulf %50, %49 : vector<16x64xf32>
    %cst_25 = arith.constant 5.000000e-01 : f32
    %52 = vector.broadcast %cst_25 : f32 to vector<16x64xf32>
    %53 = arith.addf %51, %52 : vector<16x64xf32>
    %54 = vector.extract_strided_slice %32 {offsets = [0, 128], sizes = [16, 64], strides = [1, 1]} : vector<16x192xf32> to vector<16x64xf32>
    %55 = vector.extract_strided_slice %33 {offsets = [0, 128], sizes = [16, 64], strides = [1, 1]} : vector<16x192xf32> to vector<16x64xf32>
    %56 = arith.mulf %43, %55 : vector<16x64xf32>
    %57 = arith.addf %54, %56 : vector<16x64xf32>
    %58 = math.tanh %57 : vector<16x64xf32>
    %cst_26 = arith.constant 1.000000e+00 : f32
    %59 = vector.broadcast %cst_26 : f32 to vector<16x64xf32>
    %60 = arith.subf %59, %53 : vector<16x64xf32>
    %61 = arith.mulf %60, %58 : vector<16x64xf32>
    %62 = arith.mulf %53, %7 : vector<16x64xf32>
    %63 = arith.addf %61, %62 : vector<16x64xf32>
    %64 = tpu.concatenate %6, %63 in 1 : vector<16x64xf32>, vector<16x64xf32> -> vector<16x128xf32>
    %c0_27 = arith.constant 0 : index
    %c0_28 = arith.constant 0 : index
    %65 = vector.load %arg8[%c0_27, %c0_28] : memref<128x64xf32, #tpu.memory_space<vmem>>, vector<128x64xf32>
    %cst_29 = arith.constant dense<0.000000e+00> : vector<16x64xf32>
    %66 = tpu.matmul %64, %65, %cst_29 {dimension_numbers = #tpu.dot_dimension_numbers<[1], [0], [0], [1], [0, 0, 1, 1], [], []>} : vector<16x128xf32>, vector<128x64xf32>, vector<16x64xf32> -> vector<16x64xf32>
    %c0_30 = arith.constant 0 : index
    %c0_31 = arith.constant 0 : index
    %67 = vector.load %arg9[%c0_30, %c0_31] : memref<1x64xf32, #tpu.memory_space<vmem>>, vector<1x64xf32>
    %68 = vector.broadcast %67 : vector<1x64xf32> to vector<16x64xf32>
    %69 = arith.addf %66, %68 : vector<16x64xf32>
    %c0_32 = arith.constant 0 : index
    %c0_33 = arith.constant 0 : index
    %70 = vector.load %arg10[%c0_32, %c0_33] : memref<4x80xf32, #tpu.memory_space<vmem>>, vector<4x80xf32>
    %cst_34 = arith.constant dense<0.000000e+00> : vector<16x80xf32>
    %71 = tpu.matmul %25, %70, %cst_34 {dimension_numbers = #tpu.dot_dimension_numbers<[1], [0], [0], [1], [0, 0, 1, 1], [], []>} : vector<16x4xf32>, vector<4x80xf32>, vector<16x80xf32> -> vector<16x80xf32>
    %72 = vector.extract_strided_slice %71 {offsets = [0, 0], sizes = [16, 64], strides = [1, 1]} : vector<16x80xf32> to vector<16x64xf32>
    %73 = vector.extract_strided_slice %71 {offsets = [0, 64], sizes = [16, 16], strides = [1, 1]} : vector<16x80xf32> to vector<16x16xf32>
    %74 = arith.mulf %72, %69 : vector<16x64xf32>
    %c0_35 = arith.constant 0 : index
    %c0_36 = arith.constant 0 : index
    %75 = vector.load %arg11[%c0_35, %c0_36] : memref<64x16xf32, #tpu.memory_space<vmem>>, vector<64x16xf32>
    %cst_37 = arith.constant dense<0.000000e+00> : vector<16x16xf32>
    %76 = tpu.matmul %74, %75, %cst_37 {dimension_numbers = #tpu.dot_dimension_numbers<[1], [0], [0], [1], [0, 0, 1, 1], [], []>} : vector<16x64xf32>, vector<64x16xf32>, vector<16x16xf32> -> vector<16x16xf32>
    %77 = arith.addf %76, %73 : vector<16x16xf32>
    %c0_38 = arith.constant 0 : index
    %c0_39 = arith.constant 0 : index
    %78 = vector.load %arg12[%c0_38, %c0_39] : memref<1x16xf32, #tpu.memory_space<vmem>>, vector<1x16xf32>
    %79 = vector.broadcast %78 : vector<1x16xf32> to vector<16x16xf32>
    %80 = arith.addf %77, %79 : vector<16x16xf32>
    %c0_40 = arith.constant 0 : index
    %c0_41 = arith.constant 0 : index
    %81 = vector.load %arg14[%c0_40, %c0_41] : memref<16x64xf32, #tpu.memory_space<vmem>>, vector<16x64xf32>
    tpu.vector_store %arg14[%c0_40, %c0_41], %63 {strides = array<i32>} : memref<16x64xf32, #tpu.memory_space<vmem>>, vector<16x64xf32>,
    %cst_42 = arith.constant 0.000000e+00 : f32
    %82 = vector.broadcast %cst_42 : f32 to vector<16x48xf32>
    %83 = tpu.concatenate %63, %80, %82 in 1 : vector<16x64xf32>, vector<16x16xf32>, vector<16x48xf32> -> vector<16x128xf32>
    %c0_43 = arith.constant 0 : index
    %c0_44 = arith.constant 0 : index
    %c0_45 = arith.constant 0 : index
    %84 = vector.load %arg13[%c0_43, %c0_44, %c0_45] : memref<1x16x128xf32, #tpu.memory_space<vmem>>, vector<1x16x128xf32>
    %85 = vector.shape_cast %84 : vector<1x16x128xf32> to vector<16x128xf32>
    %86 = vector.shape_cast %83 : vector<16x128xf32> to vector<1x16x128xf32>
    tpu.vector_store %arg13[%c0_43, %c0_44, %c0_45], %86 {strides = array<i32>} : memref<1x16x128xf32, #tpu.memory_space<vmem>>, vector<1x16x128xf32>,
    return
  }
  func.func @transform_0(%arg0: i32) -> (i32, i32, i32) {
    %c0_i32 = arith.constant 0 : i32
    %c0_i32_0 = arith.constant 0 : i32
    %c0_i32_1 = arith.constant 0 : i32
    return %arg0, %c0_i32, %c0_i32_0 : i32, i32, i32
  }
  func.func @transform_1(%arg0: i32) -> (i32, i32, i32) {
    %c0_i32 = arith.constant 0 : i32
    %c0_i32_0 = arith.constant 0 : i32
    %c0_i32_1 = arith.constant 0 : i32
    return %arg0, %c0_i32, %c0_i32_0 : i32, i32, i32
  }
  func.func @transform_2(%arg0: i32) -> (i32, i32) {
    %c0_i32 = arith.constant 0 : i32
    %c0_i32_0 = arith.constant 0 : i32
    %c0_i32_1 = arith.constant 0 : i32
    return %c0_i32, %c0_i32_0 : i32, i32
  }
  func.func @transform_3(%arg0: i32) -> (i32, i32) {
    %c0_i32 = arith.constant 0 : i32
    %c0_i32_0 = arith.constant 0 : i32
    %c0_i32_1 = arith.constant 0 : i32
    return %c0_i32, %c0_i32_0 : i32, i32
  }
  func.func @transform_4(%arg0: i32) -> (i32, i32) {
    %c0_i32 = arith.constant 0 : i32
    %c0_i32_0 = arith.constant 0 : i32
    %c0_i32_1 = arith.constant 0 : i32
    return %c0_i32, %c0_i32_0 : i32, i32
  }
  func.func @transform_5(%arg0: i32) -> (i32, i32) {
    %c0_i32 = arith.constant 0 : i32
    %c0_i32_0 = arith.constant 0 : i32
    %c0_i32_1 = arith.constant 0 : i32
    return %c0_i32, %c0_i32_0 : i32, i32
  }
  func.func @transform_6(%arg0: i32) -> (i32, i32) {
    %c0_i32 = arith.constant 0 : i32
    %c0_i32_0 = arith.constant 0 : i32
    %c0_i32_1 = arith.constant 0 : i32
    return %c0_i32, %c0_i32_0 : i32, i32
  }
  func.func @transform_7(%arg0: i32) -> (i32, i32) {
    %c0_i32 = arith.constant 0 : i32
    %c0_i32_0 = arith.constant 0 : i32
    %c0_i32_1 = arith.constant 0 : i32
    return %c0_i32, %c0_i32_0 : i32, i32
  }
  func.func @transform_8(%arg0: i32) -> (i32, i32) {
    %c0_i32 = arith.constant 0 : i32
    %c0_i32_0 = arith.constant 0 : i32
    %c0_i32_1 = arith.constant 0 : i32
    return %c0_i32, %c0_i32_0 : i32, i32
  }
  func.func @transform_9(%arg0: i32) -> (i32, i32) {
    %c0_i32 = arith.constant 0 : i32
    %c0_i32_0 = arith.constant 0 : i32
    %c0_i32_1 = arith.constant 0 : i32
    return %c0_i32, %c0_i32_0 : i32, i32
  }
  func.func @transform_10(%arg0: i32) -> (i32, i32) {
    %c0_i32 = arith.constant 0 : i32
    %c0_i32_0 = arith.constant 0 : i32
    %c0_i32_1 = arith.constant 0 : i32
    return %c0_i32, %c0_i32_0 : i32, i32
  }
  func.func @transform_11(%arg0: i32) -> (i32, i32) {
    %c0_i32 = arith.constant 0 : i32
    %c0_i32_0 = arith.constant 0 : i32
    %c0_i32_1 = arith.constant 0 : i32
    return %c0_i32, %c0_i32_0 : i32, i32
  }
  func.func @transform_12(%arg0: i32) -> (i32, i32, i32) {
    %c0_i32 = arith.constant 0 : i32
    %c0_i32_0 = arith.constant 0 : i32
    %c0_i32_1 = arith.constant 0 : i32
    return %arg0, %c0_i32, %c0_i32_0 : i32, i32, i32
  }
}

</mosaic_0001>

<bundles_post_ra>
// kernel: tpu_custom_call.1
= control target key start
LH: loop header
LB: loop body
LE: loop exit
PB: predicated region body
PF: predicated region fallthrough
CT: control target
= control target key end

     0   :  { %s2330_s0 = inlined_call_operand.vmem [shape: f32[8,16,32], index: 0, kind: input, shape index: {}]   ;;  %s2331_s1 = inlined_call_operand.vmem [shape: f32[8,16,64], index: 1, kind: input, shape index: {}]   ;;  %s2332_s2 = inlined_call_operand.vmem [shape: f32[16,64], index: 2, kind: input, shape index: {}]   ;;  %s2333_s3 = inlined_call_operand.hbm [shape: f32[32,68], index: 3, kind: input, shape index: {}]   ;;  %s2334_s4 = inlined_call_operand.vmem [shape: f32[1,68], index: 4, kind: input, shape index: {}]   ;;  %s2335_s5 = inlined_call_operand.hbm [shape: f32[128,384], index: 5, kind: input, shape index: {}]   ;;  %s2336_s6 = inlined_call_operand.hbm [shape: f32[1,384], index: 6, kind: input, shape index: {}]   ;;  %s2337_s7 = inlined_call_operand.vmem [shape: f32[128,64], index: 7, kind: input, shape index: {}]   ;;  %s2338_s8 = inlined_call_operand.vmem [shape: f32[1,64], index: 8, kind: input, shape index: {}]   ;;  %s2339_s9 = inlined_call_operand.hbm [shape: f32[4,80], index: 9, kind: input, shape index: {}]   ;;  %s2340_s10 = inlined_call_operand.vmem [shape: f32[64,16], index: 10, kind: input, shape index: {}]   ;;  %s2341_s11 = inlined_call_operand.hbm [shape: f32[1,16], index: 11, kind: input, shape index: {}]   ;;  %s2342_s12 = inlined_call_operand.hbm [shape: f32[8,16,128], index: 12, kind: output, shape index: {}]  }
   0x1   :  { %2350 = sst [smem:[#allocation21_spill]] %s2335_s5 }
   0x2   :  { %17 = vsyncpa [#allocation4], 0 }
   0x3   :  { %18 = vsyncpa [#allocation7], 0 }
   0x4   :  { %19 = vsyncpa [#allocation10], 0 }
   0x5   :  { %20 = vsyncpa [#allocation5], 0 }
   0x6   :  { %22 = vsyncpa [#allocation5 + $0x1], 0  ;;  %s1987_s21 = smov 0   ;;  %s1989_s22 = smov 0  }
   0x7   :  { %s1991_s23 = smov 0   ;;  %s1993_s24 = smov 0  }
   0x8 LB: > { %2351 = sst [smem:[#allocation17_spill]] %s1902_s23  ;;  %s2008_s25 = sadd.s32 4294967295, %s1906_s24   ;;  %s1906_s24 = sphi %s1993_s24, %s2372_s24   ;;  %s1902_s23 = sphi %s1991_s23, %s2374_s23   ;;  %s1898_s22 = sphi %s1989_s22, %s2376_s22   ;;  %s1894_s21 = sphi %s1987_s21, %s2375_s21  }
   0x9   : > { %s1388_s26 = sadd.s32 4294967294, %s1906_s24   ;;  %s2012_s27 = sadd.s32 1, %s1906_s24  }
   0xa   : > { %2352 = sst [smem:[#allocation18_spill]] %s2012_s27  ;;  %s297_s28 = sadd.s32 1, %s1902_s23 }
   0xb   : > { %s294_s29 = ssub.s32 %s1906_s24, %s2012_s27  ;;  %p307_p0 = scmp.ne.s32.totalorder %s1902_s23, %s1898_s22 }
   0xc   : > { %p295_p1 = scmp.eq.s32.totalorder %s294_s29, 0  ;;  %p308_p2 = scmp.eq.s32.totalorder %s2008_s25, 7 }
   0xd   : > { %p313_p3 = scmp.ne.s32.totalorder %s1898_s22, %s1894_s21  ;;  %p314_p4 = scmp.eq.s32.totalorder %s1388_s26, 7 }
   0xe   : > { %s2023_s30 = scalar_select %p295_p1, %s1902_s23, %s297_s28  }
   0xf   : > { %p2025_p5 = por %p308_p2, %p307_p0  ;;  %p2029_p6 = por %p314_p4, %p313_p3 }
  0x10   : > { %2353 = sst [smem:[#allocation19_spill]] %s2023_s30  ;;  %p1389_p7 = scmp.ge.s32.totalorder %s1906_s24, 1 }
  0x11   : > { %s2354_s13 = scalar_select %p2025_p5, 1, 0 }
  0x12   : > { %s2355_s14 = scalar_select %p2029_p6, 1, 0 }
  0x13   : > { %p321_p8 = scmp.lt.s32.totalorder %s1906_s24, 9  ;;  %p2346_p10 = scmp.eq.s32.totalorder %s2008_s25, 0 }
  0x14   : > { %2356 = sst [smem:[#allocation20_spill]] %s2355_s14  ;;  %s1908_s16 = smov [#allocation6]  }
  0x15   : > { %p2037_p11 = pnand %p1389_p7, %p321_p8  ;;  %s352_s17 = sshll.u32 %s1908_s16, 4  ;;  %s353_s17 = int_to_ptr.vmem [resolvable:$true] %s352_s17 }
  0x16   : > { %s1909_s19 = smov [#allocation9]   ;;  %s1910_s26 = smov [#allocation3]  }
  0x17   : > { %s2357_s15 = scalar_select %p2037_p11, 1, 0 }
  0x18   : > { %p1608_p12 = pneg %p2037_p11  ;;  %s383_s20 = sshll.u32 %s1909_s19, 4  ;;  %s384_s20 = int_to_ptr.vmem [resolvable:$true] %s383_s20 }
  0x19   : > { %s336_s28 = sshll.u32 %s1910_s26, 4  ;;  %s1715_s16 = scalar_lea.vmem %s353_s17, 6144  ;;  %s337_s28 = int_to_ptr.vmem [resolvable:$true] %s336_s28 }
  0x1a   : > { %p2045_p13 = pnand %p2346_p10, %p1608_p12  ;;  %p1716_p1 = scmp.ne.s32.totalorder %s353_s17, %s1715_s16 }
  0x1b   : > { %p1723_p4 = scmp.lt.s32.totalorder %s353_s17, %s353_s17  ;;  %p1724_p7 = scmp.lt.s32.totalorder %s1715_s16, %s1715_s16 }
  0x1c   : > { %p2051_p0 = pneg %p2045_p13 }
  0x1d   : > { %p1725_p8 = por %p1724_p7, %p1723_p4 }
  0x1e   : > { %p1718_p2 = pnand %p1716_p1, %p2051_p0 }
  0x20   : > { %p1719_p3 = pneg %p1718_p2 }
  0x22   : > { %p1726_p12 = pnand %p1725_p8, %p1719_p3 }
  0x24   : > { %1729 = shalt.err (!%p1726_p12)
}
  0x25   : > { %s1911_s19 = smov 384   ;;  %s1912_s26 = smov 24  }
  0x26   : > { %s2360_s5 = sld [smem:[#allocation21_spill]]  ;;  %s1741_s27 = scalar_lea.vmem %s384_s20, 64 }
  0x27   : > { %p1742_p9 = scmp.ne.s32.totalorder %s384_s20, %s1741_s27  ;;  %p1749_p2 = scmp.lt.s32.totalorder %s384_s20, %s384_s20 }
  0x28   : > { %p1750_p6 = scmp.lt.s32.totalorder %s1741_s27, %s1741_s27 }
  0x29   : > { %p1744_p10 = pnand %p1742_p9, %p2051_p0 }
  0x2a   : > { %p1751_p5 = por %p1750_p6, %p1749_p2 }
  0x2b   : > { %p1745_p1 = pneg %p1744_p10 }
  0x2c   : > { %1614 = dma.hbm_to_vmem [thread:$0]  (!%p2045_p13), %s2360_s5, 6144, %s353_s17, [#allocation7], %s1911_s19, %s1911_s19, %s1912_s26  }
  0x2d   : > { %p1752_p4 = pnand %p1751_p5, %p1745_p1 }
  0x2f   : > { %1755 = shalt.err (!%p1752_p4)
}
  0x30   : > { %1620 = dma.hbm_to_vmem [thread:$0]  (!%p2045_p13), %s2339_s9, 64, %s384_s20, [#allocation10]  }
  0x31   : > { %s1767_s23 = scalar_lea.vmem %s337_s28, 512  ;;  %p1775_p9 = scmp.lt.s32.totalorder %s337_s28, %s337_s28 }
  0x32   : > { %p1768_p3 = scmp.ne.s32.totalorder %s337_s28, %s1767_s23  ;;  %p1776_p10 = scmp.lt.s32.totalorder %s1767_s23, %s1767_s23 }
  0x34   : > { %p1770_p7 = pnand %p1768_p3, %p2051_p0  ;;  %p1777_p12 = por %p1776_p10, %p1775_p9 }
  0x36   : > { %p1771_p8 = pneg %p1770_p7 }
  0x38   : > { %p1778_p11 = pnand %p1777_p12, %p1771_p8 }
  0x3a   : > { %1781 = shalt.err (!%p1778_p11)
}
  0x3b   : > { %s1913_s27 = smov 128   ;;  %s1914_s30 = smov 8  }
  0x3c   : > { %1611 = dma.hbm_to_vmem [thread:$0]  (!%p2045_p13), %s2333_s3, 512, %s337_s28, [#allocation4], %s1913_s27, %s1913_s27, %s1914_s30  }
  0x3d   : > { %s1915_s20 = smov [#allocation8]   ;;  %s1916_s26 = smov [#allocation11]  }
  0x3e   : > { %s366_s19 = sshll.u32 %s1915_s20, 4  ;;  %s397_s16 = sshll.u32 %s1916_s26, 4  ;;  %s367_s19 = int_to_ptr.vmem [resolvable:$true] %s366_s19  ;;  %s398_s16 = int_to_ptr.vmem [resolvable:$true] %s397_s16 }
  0x3f   : > { %s1793_s5 = scalar_lea.vmem %s367_s19, 48  ;;  %s1800_s23 = scalar_lea.vmem %s367_s19, 64 }
  0x40   : > { %p1794_p5 = scmp.ne.s32.totalorder %s367_s19, %s1793_s5  ;;  %p1801_p11 = scmp.lt.s32.totalorder %s367_s19, %s367_s19 }
  0x41   : > { %p1802_p2 = scmp.lt.s32.totalorder %s1800_s23, %s1793_s5 }
  0x42   : > { %p1796_p6 = pnand %p1794_p5, %p2051_p0 }
  0x43   : > { %p1803_p4 = por %p1802_p2, %p1801_p11 }
  0x44   : > { %p1797_p1 = pneg %p1796_p6 }
  0x46   : > { %p1804_p3 = pnand %p1803_p4, %p1797_p1 }
  0x48   : > { %1807 = shalt.err (!%p1804_p3)
}
  0x49   : > { %1617 = dma.hbm_to_vmem [thread:$0]  (!%p2045_p13), %s2336_s6, 48, %s367_s19, [#allocation7]  }
  0x4a   : > { %s1819_s27 = scalar_lea.vmem %s398_s16, 16  ;;  %s1826_s30 = scalar_lea.vmem %s398_s16, 32 }
  0x4b   : > { %p1820_p7 = scmp.ne.s32.totalorder %s398_s16, %s1819_s27  ;;  %p1827_p10 = scmp.lt.s32.totalorder %s398_s16, %s398_s16 }
  0x4c   : > { %p1828_p12 = scmp.lt.s32.totalorder %s1826_s30, %s1819_s27 }
  0x4d   : > { %p1822_p8 = pnand %p1820_p7, %p2051_p0 }
  0x4e   : > { %p1829_p5 = por %p1828_p12, %p1827_p10 }
  0x4f   : > { %p1823_p9 = pneg %p1822_p8 }
  0x51   : > { %p1830_p6 = pnand %p1829_p5, %p1823_p9 }
  0x53   : > { %1833 = shalt.err (!%p1830_p6)
}
  0x54   : > { %1623 = dma.hbm_to_vmem [thread:$0]  (!%p2045_p13), %s2341_s11, 16, %s398_s16, [#allocation10]  }
  0x55   : > { %p2361_p1 = scmp.ne.s32.totalorder %s2357_s15, 0 }
  0x56   : > { %p2362_p11 = scmp.eq.s32.totalorder (!%p2361_p1), %s2008_s25, 0 }
  0x57   : > { %426 = sbr.rel (%p2361_p1) target bundleno = 1403 (0x57b), region = 68 }
  0x5c   : > { %1877 = dma.done.wait (%p2362_p11), [#allocation4], 512   ;;  %p2363_p0 = pmov %p2362_p11 }
  0x5e   : > { %1879 = vsyncadd (%p2363_p0), [#allocation4], 4294966784  ;;  %p2364_p2 = pmov %p2363_p0 }
  0x5f   : > { %p2365_p4 = pmov %p2363_p0 }
  0x60   : > { %1881 = dma.done.wait (%p2364_p2), [#allocation7], 6192  }
  0x61   : > { %1883 = vsyncadd (%p2365_p4), [#allocation7], 4294961104  ;;  %p2366_p3 = pmov %p2363_p0 }
  0x62   : > { %p2367_p13 = pmov %p2363_p0 }
  0x63   : > { %1885 = dma.done.wait (%p2366_p3), [#allocation10], 80  }
  0x64   : > { %1887 = vsyncadd (%p2367_p13), [#allocation10], 4294967216  ;;  %s486_s15 = sand.u32 1, %s1898_s22   ;;  %p489_p7 = scmp.lt.s32.totalorder %s2008_s25, 7 }
  0x65   : > { %s1402_s18 = sshll.u32 %s486_s15, 4  ;;  %p2368_p8 = scmp.ne.s32.totalorder %s2008_s25, 0 }
  0x66   : > { %s490_s29 = scalar_select %p489_p7, %s2008_s25, 7 }
  0x67   : > { %s2119_s27 = scalar_lea.vmem [#allocation12], %s1402_s18  ;;  %502 = sbr.rel (%p2368_p8) target bundleno = 110 (0x6e), region = 92 }
  0x68   : > { %s1423_s20 = sshll.u32 %s490_s29, 4 }
  0x69   : > { %s2112_s16 = scalar_lea.vmem %s2330_s0, %s1423_s20  ;;  %s2117_s28 = scalar_lea.vmem %s2331_s1, %s1423_s20 }
  0x6c   : > { %v503_v0 = vld [vmem:[%s2332_s2] sm:$0xff]  ;;  %vm505_vm0 = vcmask 523264   ;;  %v504_v1 = vld [vmem:[%s2332_s2 + $0x8] sm:$0xff] }
  0x6d   : > { %506 = vst.msk [vmem:[#allocation2] sm:$0xff] %vm505_vm0, %v503_v0  ;;  %507 = vst.msk [vmem:[#allocation2 + $0x8] sm:$0xff] %vm505_vm0, %v504_v1 }
  0x6e PF: > { %v517_v2 = vld [vmem:[#allocation3 + $0x18] sm:$0xff]  ;;  %v516_v3 = vld [vmem:[#allocation3 + $0x10] sm:$0xff]  ;;  %vm525_vm1 = vcmask 261120   ;;  %v515_v5 = vld [vmem:[#allocation3 + $0x8] sm:$0xff]  ;;  %s1917_s18 = smov 64   ;;  %v1918_v58 = vmov 0.0  }
  0x6f   : > { %1481 = vmatprep.subr.mxu0 %v517_v2  ;;  %v508_v4 = vld [vmem:[%s2112_s16] sm:$0xff]  ;;  %v697_v8 = vld [vmem:[#allocation6 + $0x168] sm:$0xff]  ;;  %v695_v9 = vld [vmem:[#allocation6 + $0x158] sm:$0xff]  ;;  %781 = vmatprep.mubr.f32.mxu1 %v1918_v58  ;;  %vm609_vm2 = vcmask 556544   ;;  %vm649_vm3 = vcmask 523264   ;;  %vm630_vm4 = vcmask 31744  }
  0x70   : > { %1482 = vmatpush3.msra.mxu0 %v517_v2  ;;  %1489 = vmatprep.mubr.msk.f32.mxu0 %vm525_vm1, %v508_v4  ;;  %v698_v7 = vld [vmem:[#allocation6 + $0x170] sm:$0xff]  ;;  %v514_v10 = vld [vmem:[#allocation3] sm:$0xff]  ;;  %v509_v13 = vld [vmem:[%s2112_s16 + $0x8] sm:$0xff]  ;;  %vm1038_vm5 = vcmask 1043456   ;;  %vm1245_vm6 = vcmask 654336   ;;  %s1264_s19 = sshll.u32 %s2119_s27, 4  ;;  %s2283_s19 = int_to_ptr.vmem [resolvable:$true] %s1264_s19 }
  0x71   : > { %1483 = vmatprep.subr.mxu0 %v516_v3  ;;  %717 = vmatprep.subr.mxu1 %v698_v7  ;;  %v694_v12 = vld [vmem:[#allocation6 + $0x150] sm:$0xff]  ;;  %v699_v14 = vld [vmem:[#allocation6 + $0x178] sm:$0xff]  ;;  %v692_v15 = vld [vmem:[#allocation6 + $0x140] sm:$0xff]  ;;  %p2369_p10 = scmp.ne.s32.totalorder %s2354_s13, 0  ;;  %s1919_s17 = smov [#allocation12]  }
  0x72   : > { %1484 = vmatpush3.msra.mxu0 %v516_v3  ;;  %718 = vmatpush1.msra.mxu1 %v697_v8  ;;  %v696_v16 = vld [vmem:[#allocation6 + $0x160] sm:$0xff]  ;;  %v691_v17 = vld [vmem:[#allocation6 + $0x138] sm:$0xff]  ;;  %v689_v18 = vld [vmem:[#allocation6 + $0x128] sm:$0xff]  ;;  %v702_v8 = vlaneseq  ;;  %s1838_s30 = sshll.u32 %s1919_s17, 4  ;;  %s1839_s30 = int_to_ptr.vmem [resolvable:$false] %s1838_s30 }
  0x73   : > { %1485 = vmatprep.subr.mxu0 %v515_v5  ;;  %719 = vmatprep.subr.mxu1 %v695_v9  ;;  %v693_v19 = vld [vmem:[#allocation6 + $0x148] sm:$0xff]  ;;  %v688_v20 = vld [vmem:[#allocation6 + $0x120] sm:$0xff]  ;;  %v686_v21 = vld [vmem:[#allocation6 + $0x110] sm:$0xff]  ;;  %s1840_s5 = scalar_lea.vmem %s1839_s30, 512  ;;  %p1841_p6 = scmp.lt.s32.totalorder %s2283_s19, %s1839_s30 }
  0x74   : > { %v512_v6 = vld [vmem:[#allocation2] sm:$0xff]  ;;  %v513_v11 = vld [vmem:[#allocation2 + $0x8] sm:$0xff]  ;;  %1486 = vmatpush3.msra.mxu0 %v515_v5  ;;  %720 = vmatpush1.msra.mxu1 %v694_v12  ;;  %v685_v23 = vld [vmem:[#allocation6 + $0x108] sm:$0xff]  ;;  %v703_v9 = vshrl.u32 %v702_v8, 7 }
  0x75   : > { %643 = vrot.lane.b32.xlu0 %v512_v6, %s1917_s18  ;;  %1487 = vmatprep.subr.mxu0 %v514_v10  ;;  %v690_v22 = vld [vmem:[#allocation6 + $0x130] sm:$0xff]  ;;  %v683_v24 = vld [vmem:[#allocation6 + $0xf8] sm:$0xff]  ;;  %v680_v27 = vld [vmem:[#allocation6 + $0xe0] sm:$0xff] }
  0x76   : > { %1488 = vmatpush3.msra.mxu0 %v514_v10  ;;  %721 = vmatprep.subr.mxu1 %v692_v15  ;;  %v687_v25 = vld [vmem:[#allocation6 + $0x118] sm:$0xff]  ;;  %v682_v26 = vld [vmem:[#allocation6 + $0xf0] sm:$0xff]  ;;  %v684_v28 = vld [vmem:[#allocation6 + $0x100] sm:$0xff] }
  0x77   : > { %1490 = vmatmul.mubr.msk.f32.vlgmr.msra.gmra.mxu0 %vm525_vm1, %v509_v13  ;;  %1492 = vmatprep.subr.mxu0 %v699_v14  ;;  %v679_v29 = vld [vmem:[#allocation6 + $0xd8] sm:$0xff]  ;;  %v677_v30 = vld [vmem:[#allocation6 + $0xc8] sm:$0xff]  ;;  %v676_v32 = vld [vmem:[#allocation6 + $0xc0] sm:$0xff]  ;;  %v712_v13 = vsub.s32 2, %v703_v9 }
  0x78   : > { %1493 = vmatpush3.msra.mxu0 %v699_v14  ;;  %722 = vmatpush1.msra.mxu1 %v691_v17  ;;  %v681_v31 = vld [vmem:[#allocation6 + $0xe8] sm:$0xff]  ;;  %v674_v33 = vld [vmem:[#allocation6 + $0xb0] sm:$0xff]  ;;  %v671_v36 = vld [vmem:[#allocation6 + $0x98] sm:$0xff] }
  0x79   : > { %645 = vrot.lane.b32.xlu0 %v513_v11, %s1917_s18  ;;  %1494 = vmatprep.subr.mxu0 %v696_v16  ;;  %v678_v34 = vld [vmem:[#allocation6 + $0xd0] sm:$0xff]  ;;  %v673_v35 = vld [vmem:[#allocation6 + $0xa8] sm:$0xff]  ;;  %v675_v37 = vld [vmem:[#allocation6 + $0xb8] sm:$0xff]  ;;  %v704_v11 = vsub.s32 0, %v703_v9 }
  0x7a   : > { %1495 = vmatpush3.msra.mxu0 %v696_v16  ;;  %723 = vmatprep.subr.mxu1 %v689_v18  ;;  %v670_v38 = vld [vmem:[#allocation6 + $0x90] sm:$0xff]  ;;  %v668_v39 = vld [vmem:[#allocation6 + $0x80] sm:$0xff]  ;;  %v667_v41 = vld [vmem:[#allocation6 + $0x78] sm:$0xff] }
  0x7b   : > { %1496 = vmatprep.subr.mxu0 %v693_v19  ;;  %724 = vmatpush1.msra.mxu1 %v688_v20  ;;  %v672_v40 = vld [vmem:[#allocation6 + $0xa0] sm:$0xff]  ;;  %v665_v42 = vld [vmem:[#allocation6 + $0x68] sm:$0xff]  ;;  %v662_v45 = vld [vmem:[#allocation6 + $0x50] sm:$0xff] }
  0x7c   : > { %1497 = vmatpush3.msra.mxu0 %v693_v19  ;;  %725 = vmatprep.subr.mxu1 %v686_v21  ;;  %v669_v43 = vld [vmem:[#allocation6 + $0x88] sm:$0xff]  ;;  %v664_v44 = vld [vmem:[#allocation6 + $0x60] sm:$0xff]  ;;  %v666_v46 = vld [vmem:[#allocation6 + $0x70] sm:$0xff] }
  0x7d   : > { %1498 = vmatprep.subr.mxu0 %v690_v22  ;;  %726 = vmatpush1.msra.mxu1 %v685_v23  ;;  %v661_v47 = vld [vmem:[#allocation6 + $0x48] sm:$0xff]  ;;  %v663_v48 = vld [vmem:[#allocation6 + $0x58] sm:$0xff]  ;;  %v658_v50 = vld [vmem:[#allocation6 + $0x30] sm:$0xff]  ;;  %v708_v23 = vsub.s32 1, %v703_v9 }
  0x7e   : > { %1499 = vmatpush3.msra.mxu0 %v690_v22  ;;  %727 = vmatprep.subr.mxu1 %v683_v24  ;;  %v659_v49 = vld [vmem:[#allocation6 + $0x38] sm:$0xff]  ;;  %v660_v51 = vld [vmem:[#allocation6 + $0x40] sm:$0xff]  ;;  %v657_v54 = vld [vmem:[#allocation6 + $0x28] sm:$0xff] }
  0x7f   : > { %1500 = vmatprep.subr.mxu0 %v687_v25  ;;  %728 = vmatpush1.msra.mxu1 %v682_v26  ;;  %v656_v52 = vld [vmem:[#allocation6 + $0x20] sm:$0xff]  ;;  %v655_v53 = vld [vmem:[#allocation6 + $0x18] sm:$0xff]  ;;  %v653_v55 = vld [vmem:[#allocation6 + $0x8] sm:$0xff] }
  0x80   : > { %1501 = vmatpush3.msra.mxu0 %v687_v25  ;;  %729 = vmatprep.subr.mxu1 %v680_v27  ;;  %v652_v56 = vld [vmem:[#allocation6] sm:$0xff]  ;;  %v654_v57 = vld [vmem:[#allocation6 + $0x10] sm:$0xff] }
  0x81   : > { %1502 = vmatprep.subr.mxu0 %v684_v28  ;;  %730 = vmatpush1.msra.mxu1 %v679_v29  ;;  %v1408_v59 = vld [vmem:[%s2334_s4] ss:$0 sm:$0xff]  ;;  %v700_v10 = vld [vmem:[#allocation8] sm:$0x7] }
  0x82   : > { %1503 = vmatpush3.msra.mxu0 %v684_v28  ;;  %731 = vmatprep.subr.mxu1 %v677_v30  ;;  %v705_v12 = vrot.slane %v700_v10, %v704_v11  ;;  %v713_v14 = vrot.slane %v700_v10, %v712_v13  ;;  %v709_v24 = vrot.slane %v700_v10, %v708_v23  ;;  %v932_v11 = vld [vmem:[%s2337_s7 + $0x18] sm:$0xff] }
  0x83   : > { %1504 = vmatprep.subr.mxu0 %v681_v31  ;;  %732 = vmatpush1.msra.mxu1 %v676_v32 }
  0x84   : > { %1505 = vmatpush3.msra.mxu0 %v681_v31  ;;  %733 = vmatprep.subr.mxu1 %v674_v33 }
  0x85   : > { %1506 = vmatprep.subr.mxu0 %v678_v34  ;;  %734 = vmatpush1.msra.mxu1 %v673_v35 }
  0x86   : > { %1507 = vmatpush3.msra.mxu0 %v678_v34  ;;  %735 = vmatprep.subr.mxu1 %v671_v36 }
  0x87   : > { %1508 = vmatprep.subr.mxu0 %v675_v37  ;;  %736 = vmatpush1.msra.mxu1 %v670_v38 }
  0x88   : > { %1509 = vmatpush3.msra.mxu0 %v675_v37  ;;  %737 = vmatprep.subr.mxu1 %v668_v39 }
  0x89   : > { %1510 = vmatprep.subr.mxu0 %v672_v40  ;;  %738 = vmatpush1.msra.mxu1 %v667_v41  ;;  %v944_v41 = vld [vmem:[%s2337_s7 + $0x78] sm:$0xff] }
  0x8a   : > { %1511 = vmatpush3.msra.mxu0 %v672_v40  ;;  %739 = vmatprep.subr.mxu1 %v665_v42  ;;  %v943_v42 = vld [vmem:[%s2337_s7 + $0x70] sm:$0xff] }
  0x8b   : > { %1512 = vmatprep.subr.mxu0 %v669_v43  ;;  %740 = vmatpush1.msra.mxu1 %v664_v44  ;;  %v941_v44 = vld [vmem:[%s2337_s7 + $0x60] sm:$0xff] }
  0x8c   : > { %1513 = vmatpush3.msra.mxu0 %v669_v43  ;;  %741 = vmatprep.subr.mxu1 %v662_v45  ;;  %v942_v43 = vld [vmem:[%s2337_s7 + $0x68] sm:$0xff]  ;;  %v940_v45 = vld [vmem:[%s2337_s7 + $0x58] sm:$0xff] }
  0x8d   : > { %1514 = vmatprep.subr.mxu0 %v666_v46  ;;  %742 = vmatpush1.msra.mxu1 %v661_v47  ;;  %v938_v47 = vld [vmem:[%s2337_s7 + $0x48] sm:$0xff] }
  0x8e   : > { %1515 = vmatpush3.msra.mxu0 %v666_v46  ;;  %743 = vmatprep.subr.mxu1 %v659_v49  ;;  %v939_v46 = vld [vmem:[%s2337_s7 + $0x50] sm:$0xff]  ;;  %v936_v49 = vld [vmem:[%s2337_s7 + $0x38] sm:$0xff] }
  0x8f   : > { %1516 = vmatprep.subr.mxu0 %v663_v48  ;;  %744 = vmatpush1.msra.mxu1 %v658_v50 }
  0x90   : > { %1517 = vmatpush3.msra.mxu0 %v663_v48  ;;  %745 = vmatprep.subr.mxu1 %v656_v52  ;;  %v937_v48 = vld [vmem:[%s2337_s7 + $0x40] sm:$0xff] }
  0x91   : > { %1518 = vmatprep.subr.mxu0 %v660_v51  ;;  %746 = vmatpush1.msra.mxu1 %v655_v53 }
  0x92   : > { %1519 = vmatpush3.msra.mxu0 %v660_v51  ;;  %747 = vmatprep.subr.mxu1 %v653_v55 }
  0x93   : > { %1520 = vmatprep.subr.mxu0 %v657_v54  ;;  %748 = vmatpush1.msra.mxu1 %v652_v56 }
  0x94   : > { %1521 = vmatpush3.msra.mxu0 %v657_v54  ;;  %1527 = vmatprep.subr.mxu1 %v944_v41 }
  0x95   : > { %1522 = vmatprep.subr.mxu0 %v654_v57 }
  0x96   : > { %1523 = vmatpush3.msra.mxu0 %v654_v57 }
  0xe7   : > { %v2138_v60 = vpop.permute.xlu0 %643 }
  0xeb   : > { %v2140_v3 = vpop.permute.xlu0 %645 }
 0x137   : > { %v1491_v61 = vpop.f32.mrf.mxu0 }
 0x138   : > { %v604_v62 = vadd.f32 %v1491_v61, %v1408_v59 }
 0x139   : > { %v598_v63 = vpop.f32.mrf.mxu0 }
 0x13a   : > { %v599_v0 = vadd.f32 %v1408_v59, %v598_v63  ;;  %v608_v1 = vmax.f32 %v604_v62, 0.0  ;;  %v613_v7 = vsel %vm609_vm2, %v604_v62, -inf }
 0x13c   : > { %v607_v2 = vmax.f32 %v599_v0, 0.0  ;;  %v610_v4 = vsel %vm609_vm2, %v599_v0, -inf  ;;  %v651_v6 = vsel %vm649_vm3, %v608_v1, %v2140_v3  ;;  %v935_v1 = vld [vmem:[%s2337_s7 + $0x30] sm:$0xff] }
 0x13d   : > { %611 = vmax.xlane.f32.xlu1 %v610_v4 }
 0x13e   : > { %v650_v5 = vsel %vm649_vm3, %v607_v2, %v2138_v60  ;;  %v934_v2 = vld [vmem:[%s2337_s7 + $0x28] sm:$0xff] }
 0x13f   : > { %782 = vmatmul.mubr.f32.vlgmr.msra.gmra.mxu1 %v650_v5  ;;  %1524 = vmatprep.mubr.f32.mxu0 %v650_v5  ;;  %v933_v5 = vld [vmem:[%s2337_s7 + $0x20] sm:$0xff] }
 0x140   : > { %1525 = vmatmul.mubr.f32.vlgmr.msra.gmra.mxu0 %v651_v6  ;;  %787 = vmatprep.mubr.f32.mxu1 %v1918_v58 }
 0x141   : > { %614 = vmax.xlane.f32.xlu1 %v613_v7  ;;  %1528 = vmatpush3.msra.mxu1 %v944_v41 }
 0x142   : > { %1529 = vmatprep.subr.mxu1 %v943_v42 }
 0x143   : > { %788 = vmatmul.mubr.f32.gmra.mxu1 %v651_v6 }
 0x144   : > { %1530 = vmatpush3.msra.mxu1 %v943_v42 }
 0x145   : > { %1531 = vmatprep.subr.mxu1 %v942_v43 }
 0x146   : > { %1532 = vmatpush3.msra.mxu1 %v942_v43 }
 0x147   : > { %1533 = vmatprep.subr.mxu1 %v941_v44 }
 0x148   : > { %1534 = vmatpush3.msra.mxu1 %v941_v44 }
 0x149   : > { %1535 = vmatprep.subr.mxu1 %v940_v45 }
 0x14a   : > { %1536 = vmatpush3.msra.mxu1 %v940_v45  ;;  %v511_v45 = vld [vmem:[%s2117_s28 + $0x8] sm:$0xff] }
 0x14b   : > { %1537 = vmatprep.subr.mxu1 %v939_v46 }
 0x14c   : > { %1538 = vmatpush3.msra.mxu1 %v939_v46 }
 0x14d   : > { %1539 = vmatprep.subr.mxu1 %v938_v47 }
 0x14e   : > { %1540 = vmatpush3.msra.mxu1 %v938_v47 }
 0x14f   : > { %1541 = vmatprep.subr.mxu1 %v937_v48 }
 0x150   : > { %1542 = vmatpush3.msra.mxu1 %v937_v48  ;;  %v1125_v48 = vld [vmem:[%s2340_s10 + $0x30] sm:$0xff] }
 0x151   : > { %1543 = vmatprep.subr.mxu1 %v936_v49 }
 0x152   : > { %1544 = vmatpush3.msra.mxu1 %v936_v49  ;;  %v1123_v49 = vld [vmem:[%s2340_s10 + $0x20] sm:$0xff] }
 0x153   : > { %1545 = vmatprep.subr.mxu1 %v935_v1 }
 0x154   : > { %1546 = vmatpush3.msra.mxu1 %v935_v1 }
 0x155   : > { %1547 = vmatprep.subr.mxu1 %v934_v2 }
 0x156   : > { %1548 = vmatpush3.msra.mxu1 %v934_v2 }
 0x157   : > { %1549 = vmatprep.subr.mxu1 %v933_v5 }
 0x158   : > { %1550 = vmatpush3.msra.mxu1 %v933_v5 }
 0x159   : > { %1551 = vmatprep.subr.mxu1 %v932_v11 }
 0x15a   : > { %1552 = vmatpush3.msra.mxu1 %v932_v11 }
 0x1c6   : > { %v612_v15 = vpop.xlane.xlu1 %611 }
 0x1c7   : > { %v616_v16 = vsub.f32 %v599_v0, %v612_v15  ;;  %v930_v15 = vld [vmem:[%s2337_s7 + $0x8] sm:$0xff] }
 0x1c9   : > { %v618_v17 = vmul.f32 1.442695, %v616_v16  ;;  %v1027_v16 = vld [vmem:[#allocation9] sm:$0xf] }
 0x1ca   : > { %v615_v18 = vpop.xlane.xlu1 %614  ;;  %1562 = vmatprep.subr.msk.mxu0 %vm1038_vm5, %v1027_v16 }
 0x1cb   : > { %1684 = vpow2.f32 %v618_v17  ;;  %v617_v19 = vsub.f32 %v604_v62, %v615_v18  ;;  %v929_v17 = vld [vmem:[%s2337_s7] sm:$0xff]  ;;  %1563 = vmatpush3.msk.msra.mxu0 %vm1038_vm5, %v1027_v16  ;;  %v1126_v18 = vld [vmem:[%s2340_s10 + $0x38] sm:$0xff] }
 0x1cc   : > { %1567 = vmatprep.subr.mxu0 %v1126_v18 }
 0x1cd   : > { %v620_v20 = vmul.f32 1.442695, %v617_v19 }
 0x1cf   : > { %1686 = vpow2.f32 %v620_v20 }
 0x1d8   : > { %v2146_v21 = vpop.eup %1684 }
 0x1d9   : > { %624 = vrot.lane.b32.xlu0 %v2146_v21, %s1917_s18 }
 0x1dc   : > { %v2150_v22 = vpop.eup %1686 }
 0x1dd   : > { %626 = vrot.lane.b32.xlu1 %v2150_v22, %s1917_s18 }
 0x1ff   : > { %v783_v25 = vpop.f32.mrf.mxu1 }
 0x200   : > { %v2154_v26 = vadd.f32 %v783_v25, %v705_v12  ;;  %v1526_v37 = vpop.f32.mrf.mxu0 }
 0x201   : > { %v785_v27 = vpop.f32.mrf.mxu1  ;;  %v866_v39 = vadd.f32 %v1526_v37, %v713_v14 }
 0x202   : > { %v2156_v28 = vadd.f32 %v785_v27, %v709_v24  ;;  %v860_v38 = vpop.f32.mrf.mxu0 }
 0x203   : > { %v789_v29 = vpop.f32.mrf.mxu1  ;;  %v861_v40 = vadd.f32 %v860_v38, %v713_v14 }
 0x204   : > { %v2158_v30 = vadd.f32 %v789_v29, %v705_v12  ;;  %871 = vrot.lane.b32.xlu0 %v2156_v28, %s1917_s18  ;;  %v931_v12 = vld [vmem:[%s2337_s7 + $0x10] sm:$0xff] }
 0x205   : > { %v791_v31 = vpop.f32.mrf.mxu1  ;;  %1553 = vmatprep.subr.mxu1 %v931_v12 }
 0x206   : > { %v2162_v32 = vadd.f32 %v791_v31, %v709_v24  ;;  %1554 = vmatpush3.msra.mxu1 %v931_v12 }
 0x207   : > { %1555 = vmatprep.subr.mxu1 %v930_v15 }
 0x208   : > { %873 = vrot.lane.b32.xlu0 %v2162_v32, %s1917_s18  ;;  %1556 = vmatpush3.msra.mxu1 %v930_v15 }
 0x209   : > { %1557 = vmatprep.subr.mxu1 %v929_v17 }
 0x20a   : > { %1558 = vmatpush3.msra.mxu1 %v929_v17 }
 0x24b   : > { %v625_v33 = vpop.permute.xlu0 %624 }
 0x24c   : > { %v631_v34 = vsel %vm630_vm4, %v625_v33, 0.0 }
 0x24d   : > { %632 = vadd.xlane.f32.xlu0 %v631_v34 }
 0x24f   : > { %v627_v35 = vpop.permute.xlu1 %626 }
 0x250   : > { %v634_v36 = vsel %vm630_vm4, %v627_v35, 0.0 }
 0x251   : > { %635 = vadd.xlane.f32.xlu1 %v634_v36 }
 0x262   : > { %891 = vrot.lane.b32.xlu1 %v866_v39, %s1917_s18 }
 0x263   : > { %889 = vrot.lane.b32.xlu0 %v861_v40, %s1917_s18 }
 0x276   : > { %v872_v50 = vpop.permute.xlu0 %871 }
 0x277   : > { %v877_v51 = vadd.f32 %v872_v50, %v2154_v26  ;;  %v1122_v50 = vld [vmem:[%s2340_s10 + $0x18] sm:$0xff] }
 0x279   : > { %v879_v53 = vmul.f32 0.5, %v877_v51  ;;  %v1121_v51 = vld [vmem:[%s2340_s10 + $0x10] sm:$0xff] }
 0x27a   : > { %v874_v52 = vpop.permute.xlu0 %873 }
 0x27b   : > { %v878_v54 = vadd.f32 %v874_v52, %v2158_v30  ;;  %1688 = vtanh.f32 %v879_v53  ;;  %v1120_v52 = vld [vmem:[%s2340_s10 + $0x8] sm:$0xff]  ;;  %v1119_v53 = vld [vmem:[%s2340_s10] sm:$0xff] }
 0x27d   : > { %v880_v55 = vmul.f32 0.5, %v878_v54 }
 0x27f   : > { %1690 = vtanh.f32 %v880_v55  ;;  %v1411_v55 = vld [vmem:[%s2338_s8] ss:$0 sm:$0xff] }
 0x288   : > { %v1689_v56 = vpop.eup %1688 }
 0x289   : > { %v883_v57 = vmul.f32 0.5, %v1689_v56 }
 0x28b   : > { %v885_v61 = vadd.f32 0.5, %v883_v57 }
 0x28c   : > { %v1691_v58 = vpop.eup %1690 }
 0x28d   : > { %v884_v62 = vmul.f32 0.5, %v1691_v58 }
 0x28f   : > { %v886_v7 = vadd.f32 0.5, %v884_v62 }
 0x2d6   : > { %v633_v59 = vpop.xlane.xlu0 %632 }
 0x2d7   : > { %1692 = vrcp.f32 %v633_v59 }
 0x2da   : > { %v636_v63 = vpop.xlane.xlu1 %635  ;;  %v890_v0 = vpop.permute.xlu0 %889 }
 0x2db   : > { %v905_v4 = vmul.f32 %v890_v0, %v885_v61  ;;  %v895_v24 = vadd.f32 %v890_v0, %v2154_v26 }
 0x2dd   : > { %v907_v6 = vadd.f32 %v905_v4, %v2156_v28  ;;  %v897_v25 = vmul.f32 0.5, %v895_v24 }
 0x2de   : > { %v892_v8 = vpop.permute.xlu1 %891 }
 0x2df   : > { %v906_v9 = vmul.f32 %v892_v8, %v886_v7  ;;  %1694 = vtanh.f32 %v907_v6  ;;  %v896_v27 = vadd.f32 %v892_v8, %v2158_v30  ;;  %v510_v30 = vld [vmem:[%s2117_s28] sm:$0xff]  ;;  %v1417_v6 = vld [vmem:[#allocation11] ss:$0 sm:$0xff]  ;;  %s1425_s28 = sshll.u32 %s2008_s25, 8  ;;  %s2290_s25 = scalar_lea.sflag [#allocation5], %s486_s15 }
 0x2e0   : > { %1696 = vrcp.f32 %v636_v63  ;;  %s2281_s23 = scalar_lea.hbm %s2342_s12, %s1425_s28 }
 0x2e1   : > { %v908_v10 = vadd.f32 %v906_v9, %v2162_v32  ;;  %v898_v28 = vmul.f32 0.5, %v896_v27 }
 0x2e3   : > { %1698 = vtanh.f32 %v908_v10 }
 0x2e4   : > { %v1693_v13 = vpop.eup %1692  ;;  %1700 = vtanh.f32 %v897_v25 }
 0x2e5   : > { %v638_v14 = vmul.f32 %v1693_v13, %v2146_v21  ;;  %1702 = vtanh.f32 %v898_v28 }
 0x2e7   : > { %1030 = vrot.lane.b32.xlu1 %v638_v14, %s1917_s18 }
 0x2ec   : > { %v1695_v19 = vpop.eup %1694 }
 0x2ed   : > { %915 = vrot.lane.b32.xlu0 %v1695_v19, %s1917_s18  ;;  %v1697_v20 = vpop.eup %1696 }
 0x2ee   : > { %v640_v23 = vmul.f32 %v1697_v20, %v2150_v22 }
 0x2f0   : > { %v1699_v21 = vpop.eup %1698 }
 0x2f1   : > { %917 = vrot.lane.b32.xlu0 %v1699_v21, %s1917_s18  ;;  %v1701_v29 = vpop.eup %1700 }
 0x2f2   : > { %v901_v31 = vmul.f32 0.5, %v1701_v29  ;;  %v1703_v32 = vpop.eup %1702 }
 0x2f3   : > { %v902_v22 = vmul.f32 0.5, %v1703_v32 }
 0x2f4   : > { %v903_v34 = vadd.f32 0.5, %v901_v31 }
 0x2f5   : > { %1032 = vrot.lane.b32.xlu0 %v640_v23, %s1917_s18  ;;  %v904_v36 = vadd.f32 0.5, %v902_v22 }
 0x2f6   : > { %v911_v35 = vsub.f32 1.0, %v903_v34  ;;  %v923_v26 = vmul.f32 %v903_v34, %v2138_v60 }
 0x2f7   : > { %v912_v40 = vsub.f32 1.0, %v904_v36  ;;  %v924_v42 = vmul.f32 %v904_v36, %v2140_v3  ;;  %v1124_v3 = vld [vmem:[%s2340_s10 + $0x28] sm:$0xff] }
 0x359   : > { %v1031_v33 = vpop.permute.xlu1 %1030 }
 0x35a   : > { %1564 = vmatprep.mubr.msk.f32.mxu0 %vm630_vm4, %v1031_v33 }
 0x35f   : > { %v916_v37 = vpop.permute.xlu0 %915 }
 0x360   : > { %v921_v38 = vmul.f32 %v916_v37, %v911_v35 }
 0x362   : > { %v925_v39 = vadd.f32 %v923_v26, %v921_v38 }
 0x363   : > { %v918_v41 = vpop.permute.xlu0 %917 }
 0x364   : > { %v922_v43 = vmul.f32 %v918_v41, %v912_v40  ;;  %v927_v44 = vsel %vm649_vm3, %v510_v30, %v925_v39 }
 0x365   : > { %1559 = vmatprep.mubr.f32.mxu1 %v927_v44 }
 0x366   : > { %v926_v46 = vadd.f32 %v924_v42, %v922_v43 }
 0x367   : > { %v1033_v47 = vpop.permute.xlu0 %1032 }
 0x368   : > { %1565 = vmatmul.mubr.msk.f32.vlgmr.msra.gmra.mxu0 %vm630_vm4, %v1033_v47  ;;  %v928_v60 = vsel %vm649_vm3, %v511_v45, %v926_v46 }
 0x369   : > { %1560 = vmatmul.mubr.f32.vlgmr.msra.gmra.mxu1 %v928_v60  ;;  %1568 = vmatpush3.msra.mxu0 %v1126_v18 }
 0x36a   : > { %1569 = vmatprep.subr.mxu0 %v1125_v48 }
 0x36b   : > { %1570 = vmatpush3.msra.mxu0 %v1125_v48 }
 0x36c   : > { %1571 = vmatprep.subr.mxu0 %v1124_v3 }
 0x36d   : > { %1572 = vmatpush3.msra.mxu0 %v1124_v3 }
 0x36e   : > { %1573 = vmatprep.subr.mxu0 %v1123_v49 }
 0x36f   : > { %1574 = vmatpush3.msra.mxu0 %v1123_v49 }
 0x370   : > { %1575 = vmatprep.subr.mxu0 %v1122_v50 }
 0x371   : > { %1576 = vmatpush3.msra.mxu0 %v1122_v50 }
 0x372   : > { %1577 = vmatprep.subr.mxu0 %v1121_v51 }
 0x373   : > { %1578 = vmatpush3.msra.mxu0 %v1121_v51 }
 0x374   : > { %1579 = vmatprep.subr.mxu0 %v1120_v52 }
 0x375   : > { %1580 = vmatpush3.msra.mxu0 %v1120_v52 }
 0x376   : > { %1581 = vmatprep.subr.mxu0 %v1119_v53 }
 0x377   : > { %1582 = vmatpush3.msra.mxu0 %v1119_v53 }
 0x428   : > { %v1566_v54 = vpop.f32.mrf.mxu0 }
 0x429   : > { %v1561_v56 = vpop.f32.mrf.mxu1  ;;  %1131 = vrot.lane.b32.xlu0 %v1566_v54, %s1917_s18 }
 0x42a   : > { %v1108_v57 = vpop.f32.mrf.mxu0  ;;  %v1024_v58 = vadd.f32 %v1561_v56, %v1411_v55 }
 0x42b   : > { %v1018_v59 = vpop.f32.mrf.mxu1  ;;  %1129 = vrot.lane.b32.xlu1 %v1108_v57, %s1917_s18 }
 0x42c   : > { %v1019_v61 = vadd.f32 %v1411_v55, %v1018_v59  ;;  %v1118_v63 = vmul.f32 %v1566_v54, %v1024_v58 }
 0x42d   : > { %1229 = vrot.lane.b32.xlu0 %v926_v46, %s1917_s18 }
 0x42e   : > { %v1117_v62 = vmul.f32 %v1108_v57, %v1019_v61 }
 0x42f   : > { %1227 = vrot.lane.b32.xlu1 %v925_v39, %s1917_s18 }
 0x430   : > { %1583 = vmatprep.mubr.msk.f32.mxu0 %vm649_vm3, %v1117_v62 }
 0x431   : > { %1584 = vmatmul.mubr.msk.f32.vlgmr.msra.gmra.mxu0 %vm649_vm3, %v1118_v63 }
 0x49b   : > { %v1132_v0 = vpop.permute.xlu0 %1131 }
 0x49d   : > { %v1130_v1 = vpop.permute.xlu1 %1129 }
 0x49f   : > { %v1230_v2 = vpop.permute.xlu0 %1229 }
 0x4a0   : > { %1234 = vst.msk [vmem:[#allocation2 + $0x8] sm:$0xff] %vm649_vm3, %v1230_v2 }
 0x4a1   : > { %v1228_v4 = vpop.permute.xlu1 %1227 }
 0x4a2   : > { %1233 = vst.msk [vmem:[#allocation2] sm:$0xff] %vm649_vm3, %v1228_v4 }
 0x4f1   : > { %v1585_v5 = vpop.f32.mrf.mxu0 }
 0x4f2   : > { %v1213_v7 = vadd.f32 %v1585_v5, %v1132_v0 }
 0x4f3   : > { %v1207_v8 = vpop.f32.mrf.mxu0 }
 0x4f4   : > { %v1224_v9 = vadd.f32 %v1417_v6, %v1213_v7  ;;  %v1208_v10 = vadd.f32 %v1207_v8, %v1130_v1 }
 0x4f6   : > { %v1223_v11 = vadd.f32 %v1417_v6, %v1208_v10  ;;  %1239 = vrot.lane.b32.xlu0 %v1224_v9, %s1917_s18 }
 0x4f8   : > { %1237 = vrot.lane.b32.xlu1 %v1223_v11, %s1917_s18  ;;  %s1834_s18 = scalar_lea.vmem %s2283_s19, 256 }
 0x4f9   : > { %p1835_p9 = scmp.ne.s32.totalorder %s2283_s19, %s1834_s18  ;;  %p1842_p1 = scmp.lt.s32.totalorder %s1840_s5, %s1834_s18 }
 0x4fb   : > { %p1836_p12 = pnand %p1835_p9, %p2369_p10  ;;  %p1843_p11 = por %p1842_p1, %p1841_p6 }
 0x4fd   : > { %p1837_p5 = pneg %p1836_p12 }
 0x4ff   : > { %p1844_p0 = pnand %p1843_p11, %p1837_p5 }
 0x568   : > { %v1240_v12 = vpop.permute.xlu0 %1239 }
 0x569   : > { %v1244_v13 = vsel %vm649_vm3, %v1230_v2, %v1240_v12 }
 0x56a   : > { %v1247_v14 = vsel %vm1245_vm6, %v1244_v13, 0.0  ;;  %v1238_v15 = vpop.permute.xlu1 %1237 }
 0x56b   : > { %1249 = vst [vmem:[%s2119_s27 + $0x8] sm:$0xff] %v1247_v14  ;;  %v1243_v16 = vsel %vm649_vm3, %v1228_v4, %v1238_v15 }
 0x56c   : > { %v1246_v17 = vsel %vm1245_vm6, %v1243_v16, 0.0 }
 0x56d   : > { %1248 = vst [vmem:[%s2119_s27] sm:$0xff] %v1246_v17 }
 0x56e   : > { %1847 = shalt.err (!%p1844_p0)
}
 0x56f   : > { %s1848_s15 = scalar_lea.hbm %s2281_s23, 256  ;;  %s1852_s29 = scalar_lea.hbm %s2342_s12, 2048 }
 0x570   : > { %p1849_p2 = scmp.ne.s32.totalorder %s2281_s23, %s1848_s15  ;;  %p1853_p13 = scmp.lt.s32.totalorder %s2281_s23, %s2342_s12 }
 0x571   : > { %p1854_p7 = scmp.lt.s32.totalorder %s1852_s29, %s1848_s15 }
 0x572   : > { %p1850_p4 = pnand %p1849_p2, %p2369_p10 }
 0x573   : > { %p1855_p8 = por %p1854_p7, %p1853_p13 }
 0x574   : > { %p1851_p3 = pneg %p1850_p4 }
 0x576   : > { %p1856_p9 = pnand %p1855_p8, %p1851_p3 }
 0x578   : > { %1859 = shalt.err (!%p1856_p9)
}
 0x579   : > { %s1920_s26 = smov 128   ;;  %s1921_s16 = smov 8  }
 0x57a   : > { %1606 = dma.vmem_to_hbm [thread:$0]  (%p2369_p10), %s2283_s19, 256, %s2281_s23, %s2290_s25, %s1920_s26, %s1920_s26, %s1921_s16  }
 0x57b PF: > { %s2370_s18 = sld [smem:[#allocation20_spill]]  ;;  %p1638_p12 = scmp.ge.s32.totalorder %s1906_s24, 2 }
 0x57c   : > { %s1279_s17 = sand.u32 1, %s1894_s21  }
 0x57d   : > { %s1280_s30 = scalar_lea.sflag [#allocation5], %s1279_s17 }
 0x581   : > { %p2371_p5 = scmp.ne.s32.totalorder %s2370_s18, 0 }
 0x583   : > { %p1625_p6 = pnand %p1638_p12, %p2371_p5 }
 0x585   : > { %p1626_p1 = pneg %p1625_p6 }
 0x587   : > { %1889 = dma.done.wait (%p1626_p1), %s1280_s30, 256  }
 0x588   : > { %1891 = vsyncadd (%p1626_p1), %s1280_s30, 4294967040  ;;  %s2372_s24 = sld [smem:[#allocation18_spill]]  ;;  %s2375_s21 = smov %s1898_s22 }
 0x589   : > { %s2373_s5 = sld [smem:[#allocation17_spill]] }
 0x58a   : > { %s2374_s23 = sld [smem:[#allocation19_spill]] }
 0x58e   : > { %p25_p11 = scmp.ge.s32.totalorder %s2372_s24, 10  }
 0x58f   : > { %s2376_s22 = smov %s2373_s5 }
 0x590   :  { %27 = sbr.rel (!%p25_p11) target bundleno = 8 (0x8), region = 131 }
 0x595   :  { %1285 = vsyncpa [#allocation4], 1 }
 0x596   :  { %1287 = vsyncpa [#allocation4 + $0x1], 1 }
 0x597   :  { %1288 = vsyncpa [#allocation7], 1 }
 0x598   :  { %1289 = vsyncpa [#allocation10], 1 }
 0x599   :  { %1290 = vsyncpa [#allocation5], 1 }
 0x59a   :  { %1292 = vsyncpa [#allocation5 + $0x1], 1 }

</bundles_post_ra>
